<compile_context>
chip_gen: v5e
topology: v5e:2x2
jax: 0.10.0
libtpu: 0.0.40
codegen_flags: <defaults>
</compile_context>

<pallas_src>
import functools

import jax
import jax.numpy as jnp
from jax.experimental import pallas as pl
from jax.experimental.pallas import tpu as pltpu


# ------------------------------- kernels ------------------------------------

def _fused_kernel(x_ref, w1t_ref, w2t_ref, o_ref, *, inv_len):
    """Single-pass SE: squeeze (mean over L) + excitation MLP + scale.

    One grid step handles one batch row; x is read from HBM exactly once.
      x_ref  : (C, L)  full row (batch dim squeezed)
      w1t_ref: (H, C)  first Linear weight, (out, in) layout
      w2t_ref: (C, H)  second Linear weight, (out, in) layout
      o_ref  : (C, L)
    """
    y = jnp.sum(x_ref[...], axis=-1, keepdims=True,
                dtype=jnp.float32) * inv_len                          # (C, 1)
    h = jnp.dot(w1t_ref[...].astype(jnp.float32), y,
                preferred_element_type=jnp.float32)                   # (H, 1)
    h = h * jax.nn.sigmoid(h)                                         # SiLU
    g = jax.nn.sigmoid(
        jnp.dot(w2t_ref[...].astype(jnp.float32), h,
                preferred_element_type=jnp.float32))                  # (C, 1)
    o_ref[...] = x_ref[...] * g.astype(o_ref.dtype)


def _partial_sum_kernel(x_ref, ps_ref):
    """Per-(C-tile, L-tile) partial sum over L in f32 (fully parallel grid)."""
    ps_ref[...] = jnp.sum(x_ref[...], axis=-1, keepdims=True,
                          dtype=jnp.float32)


def _scale_kernel(x_ref, s_ref, o_ref):
    """Streaming elementwise scale: o = x * s (gate broadcast over L)."""
    o_ref[...] = x_ref[...] * s_ref[...]


# ------------------------------- helpers ------------------------------------

def _physical_vmem_bytes():
    """Per-core VMEM capacity; conservative 64 MiB (v7x) fallback."""
    try:
        info = pltpu.get_tpu_info()
        cap = getattr(info, "vmem_capacity_bytes", None)
        if cap:
            return int(cap)
    except Exception:
        pass
    return 64 * 1024 * 1024


def _pick_tile(dim, unit, cap):
    """Largest multiple of `unit` that divides `dim`, capped at `cap`.

    Falls back to the full dimension (block == array extent is always legal).
    """
    top = min(dim, cap)
    top -= top % unit
    for t in range(top, 0, -unit):
        if dim % t == 0:
            return t
    return dim


def _pick_tiles(C, L, itemsize, budget):
    """Pick (tc, tl) so the double-buffered in+out tile fits `budget` bytes."""
    # Sublane packing unit per dtype width: f32 -> 8, bf16 -> 16, int8/fp8 -> 32.
    tc_unit = 8 if itemsize >= 4 else (16 if itemsize == 2 else 32)
    tl = _pick_tile(L, 128, 4096)                       # lane-dense L tiles
    cap_c = max(tc_unit, (budget // (4 * tl * itemsize)) // tc_unit * tc_unit)
    tc = _pick_tile(C, tc_unit, min(512, cap_c))
    while 4 * tc * tl * itemsize > budget and tl > 128:
        new_tl = _pick_tile(L, 128, tl // 2)
        if new_tl == tl:
            break
        tl = new_tl
    return tc, tl


# ------------------------------- wrapper ------------------------------------

def se_layer(x, w1, w2, *, donate_x=False, force_two_pass=False):
    """x: (B, C, L); w1: (C, C//r); w2: (C//r, C).  Returns x * gate."""
    B, C, L = x.shape
    Cw, H = w1.shape
    assert Cw == C and w2.shape == (H, C), "weights must be (C, H) and (H, C)"

    itemsize = jnp.dtype(x.dtype).itemsize
    w_item = jnp.dtype(w1.dtype).itemsize
    phys = _physical_vmem_bytes()
    aliases = {0: 0} if donate_x else {}

    # Transpose the tiny weights once so the kernel only issues plain
    # (m,k)@(k,n) matmuls with channels kept on the sublane axis.
    w1t = jnp.asarray(w1).T   # (H, C)
    w2t = jnp.asarray(w2).T   # (C, H)

    # ---------------- fused single pass (1 read + 1 write of x) --------------
    row_bytes = C * L * itemsize
    w_bytes = 2 * C * H * w_item
    fused_need = 4 * row_bytes + 4 * w_bytes            # dbl-buffered in/out/wts
    fused_ok = (not force_two_pass) and (fused_need + (4 << 20) <= int(0.8 * phys))

    if fused_ok:
        return pl.pallas_call(
            functools.partial(_fused_kernel, inv_len=1.0 / L),
            out_shape=jax.ShapeDtypeStruct((B, C, L), x.dtype),
            grid_spec=pltpu.PrefetchScalarGridSpec(
                num_scalar_prefetch=0,
                grid=(B,),
                in_specs=[
                    pl.BlockSpec((None, C, L), lambda b: (b, 0, 0)),
                    pl.BlockSpec((H, C), lambda b: (0, 0)),
                    pl.BlockSpec((C, H), lambda b: (0, 0)),
                ],
                out_specs=pl.BlockSpec((None, C, L), lambda b: (b, 0, 0)),
            ),
            compiler_params=pltpu.CompilerParams(
                dimension_semantics=("parallel",),
                vmem_limit_bytes=int(min(phys, fused_need + (16 << 20)))),
            cost_estimate=pl.CostEstimate(
                flops=2 * B * C * L + 4 * B * C * H,
                transcendentals=B * (C + 2 * H),
                bytes_accessed=2 * B * C * L * itemsize + w_bytes),
            input_output_aliases=aliases,
        )(x, w1t, w2t)

    # ---------------- two-pass fallback (rows too large for VMEM) ------------
    tile_budget = int(min(0.6 * phys, 96 << 20))
    tc, tl = _pick_tiles(C, L, itemsize, tile_budget)
    n_ct, n_lt = C // tc, L // tl
    pass_limit = int(min(phys, 4 * tc * tl * itemsize + (8 << 20)))

    # Pass 1: fully parallel per-tile partial sums (no accumulator -> every
    # grid axis is "parallel", so v7x megacore is used even when B == 1).
    partial = pl.pallas_call(
        _partial_sum_kernel,
        out_shape=jax.ShapeDtypeStruct((B, n_lt, C, 1), jnp.float32),
        grid_spec=pltpu.PrefetchScalarGridSpec(
            num_scalar_prefetch=0,
            grid=(B, n_ct, n_lt),
            in_specs=[pl.BlockSpec((None, tc, tl), lambda b, c, l: (b, c, l))],
            out_specs=pl.BlockSpec((None, None, tc, 1),
                                   lambda b, c, l: (b, l, c, 0)),
        ),
        compiler_params=pltpu.CompilerParams(
            dimension_semantics=("parallel", "parallel", "parallel"),
            vmem_limit_bytes=pass_limit),
        cost_estimate=pl.CostEstimate(
            flops=B * C * L, transcendentals=0,
            bytes_accessed=B * C * L * itemsize + B * n_lt * C * 4),
    )(x)

    # Tiny excitation MLP for all B at once (lane-dense (B, C), plain XLA —
    # removes the 1-lane-wide per-row MXU matmuls from the kernel).
    means = jnp.sum(partial[..., 0], axis=1) * (1.0 / L)         # (B, C) f32
    h = means @ w1.astype(jnp.float32)
    h = h * jax.nn.sigmoid(h)                                     # SiLU
    gate = jax.nn.sigmoid(h @ w2.astype(jnp.float32))             # (B, C)
    gate = gate.astype(x.dtype)[:, :, None]                       # (B, C, 1)

    # Pass 2: HBM-bandwidth-bound streaming scale with large lane-dense tiles.
    return pl.pallas_call(
        _scale_kernel,
        out_shape=jax.ShapeDtypeStruct((B, C, L), x.dtype),
        grid_spec=pltpu.PrefetchScalarGridSpec(
            num_scalar_prefetch=0,
            grid=(B, n_ct, n_lt),
            in_specs=[
                pl.BlockSpec((None, tc, tl), lambda b, c, l: (b, c, l)),
                pl.BlockSpec((None, tc, 1), lambda b, c, l: (b, c, 0)),
            ],
            out_specs=pl.BlockSpec((None, tc, tl), lambda b, c, l: (b, c, l)),
        ),
        compiler_params=pltpu.CompilerParams(
            dimension_semantics=("parallel", "parallel", "parallel"),
            vmem_limit_bytes=pass_limit),
        cost_estimate=pl.CostEstimate(
            flops=B * C * L, transcendentals=0,
            bytes_accessed=2 * B * C * L * itemsize + B * C * itemsize),
        input_output_aliases=aliases,
    )(x, gate)


def se_layer_ref(x, w1, w2):
    """Pure-JAX reference (mirrors the PyTorch forward)."""
    y = jnp.mean(x, axis=-1)
    h = y @ w1
    h = h * jax.nn.sigmoid(h)
    s = jax.nn.sigmoid(h @ w2)
    return x * s[:, :, None]


if __name__ == "__main__":
    # Small shapes consistent with the module: SELayer(channel=64, reduction=16)
    B, C, L = 2, 64, 128
    reduction = 16
    H = C // reduction  # 4

    key = jax.random.PRNGKey(0)
    kx, k1, k2 = jax.random.split(key, 3)

    x = jax.random.normal(kx, (B, C, L), dtype=jnp.float32)
    # PyTorch Linear stores (out, in); here weights are (in, out).
    w1 = jax.random.normal(k1, (C, H), dtype=jnp.float32) * (1.0 / jnp.sqrt(C))
    w2 = jax.random.normal(k2, (H, C), dtype=jnp.float32) * (1.0 / jnp.sqrt(H))

    ref = jax.block_until_ready(se_layer_ref(x, w1, w2))

    # Exercise both code paths: fused (default for these shapes) and the
    # tiled two-pass fallback used for large C*L rows.
    out_fused = jax.block_until_ready(se_layer(x, w1, w2))
    out_2pass = jax.block_until_ready(se_layer(x, w1, w2, force_two_pass=True))

    assert out_fused.shape == (B, C, L)
    assert jnp.allclose(out_fused, ref, atol=2e-5, rtol=2e-5)
    assert jnp.allclose(out_2pass, ref, atol=2e-5, rtol=2e-5)
    print("KERNEL_OK")
</pallas_src>

<mosaic_0001>
module attributes {stable_mosaic.version = 11 : i64} {
  func.func @_fused_kernel(%arg0: i32, %arg1: memref<1x64x128xf32, #tpu.memory_space<vmem>>, %arg2: memref<4x64xf32, #tpu.memory_space<vmem>>, %arg3: memref<64x4xf32, #tpu.memory_space<vmem>>, %arg4: memref<1x64x128xf32, #tpu.memory_space<vmem>>) attributes {dimension_semantics = [#tpu.dimension_semantics<parallel>], iteration_bounds = array<i64: 2>, scalar_prefetch = 0 : i64, scratch_operands = 0 : i64, tpu.core_type = #tpu.core_type<tc>, window_params = [{transform_indices = @transform_0, window_bounds = array<i64: 1, 64, 128>}, {pipeline_mode = #tpu.pipeline_mode<synchronous>, transform_indices = @transform_1, window_bounds = array<i64: 4, 64>}, {pipeline_mode = #tpu.pipeline_mode<synchronous>, transform_indices = @transform_2, window_bounds = array<i64: 64, 4>}, {transform_indices = @transform_3, window_bounds = array<i64: 1, 64, 128>}]} {
    %c0 = arith.constant 0 : index
    %c0_0 = arith.constant 0 : index
    %c0_1 = arith.constant 0 : index
    %0 = vector.load %arg1[%c0, %c0_0, %c0_1] : memref<1x64x128xf32, #tpu.memory_space<vmem>>, vector<1x64x128xf32>
    %1 = vector.shape_cast %0 : vector<1x64x128xf32> to vector<64x128xf32>
    %cst = arith.constant dense<0.000000e+00> : vector<64xf32>
    %2 = vector.multi_reduction <add>, %1, %cst [1] : vector<64x128xf32> to vector<64xf32>
    %3 = vector.shape_cast %2 : vector<64xf32> to vector<64x1xf32>
    %cst_2 = arith.constant 7.812500e-03 : f32
    %4 = vector.broadcast %cst_2 : f32 to vector<64x1xf32>
    %5 = arith.mulf %3, %4 : vector<64x1xf32>
    %c0_3 = arith.constant 0 : index
    %c0_4 = arith.constant 0 : index
    %6 = vector.load %arg2[%c0_3, %c0_4] : memref<4x64xf32, #tpu.memory_space<vmem>>, vector<4x64xf32>
    %cst_5 = arith.constant dense<0.000000e+00> : vector<4x1xf32>
    %7 = tpu.matmul %6, %5, %cst_5 {dimension_numbers = #tpu.dot_dimension_numbers<[1], [0], [0], [1], [0, 0, 1, 1], [], []>} : vector<4x64xf32>, vector<64x1xf32>, vector<4x1xf32> -> vector<4x1xf32>
    %8 = arith.negf %7 : vector<4x1xf32>
    %9 = math.exp %8 : vector<4x1xf32>
    %cst_6 = arith.constant 1.000000e+00 : f32
    %10 = vector.broadcast %cst_6 : f32 to vector<4x1xf32>
    %11 = arith.addf %10, %9 : vector<4x1xf32>
    %12 = arith.divf %10, %11 : vector<4x1xf32>
    %13 = arith.mulf %7, %12 : vector<4x1xf32>
    %c0_7 = arith.constant 0 : index
    %c0_8 = arith.constant 0 : index
    %14 = vector.load %arg3[%c0_7, %c0_8] : memref<64x4xf32, #tpu.memory_space<vmem>>, vector<64x4xf32>
    %cst_9 = arith.constant dense<0.000000e+00> : vector<64x1xf32>
    %15 = tpu.matmul %14, %13, %cst_9 {dimension_numbers = #tpu.dot_dimension_numbers<[1], [0], [0], [1], [0, 0, 1, 1], [], []>} : vector<64x4xf32>, vector<4x1xf32>, vector<64x1xf32> -> vector<64x1xf32>
    %16 = arith.negf %15 : vector<64x1xf32>
    %17 = math.exp %16 : vector<64x1xf32>
    %cst_10 = arith.constant 1.000000e+00 : f32
    %18 = vector.broadcast %cst_10 : f32 to vector<64x1xf32>
    %19 = arith.addf %18, %17 : vector<64x1xf32>
    %20 = arith.divf %18, %19 : vector<64x1xf32>
    %c0_11 = arith.constant 0 : index
    %c0_12 = arith.constant 0 : index
    %c0_13 = arith.constant 0 : index
    %21 = vector.load %arg1[%c0_11, %c0_12, %c0_13] : memref<1x64x128xf32, #tpu.memory_space<vmem>>, vector<1x64x128xf32>
    %22 = vector.shape_cast %21 : vector<1x64x128xf32> to vector<64x128xf32>
    %23 = vector.broadcast %20 : vector<64x1xf32> to vector<64x128xf32>
    %24 = arith.mulf %22, %23 : vector<64x128xf32>
    %c0_14 = arith.constant 0 : index
    %c0_15 = arith.constant 0 : index
    %c0_16 = arith.constant 0 : index
    %25 = vector.load %arg4[%c0_14, %c0_15, %c0_16] : memref<1x64x128xf32, #tpu.memory_space<vmem>>, vector<1x64x128xf32>
    %26 = vector.shape_cast %25 : vector<1x64x128xf32> to vector<64x128xf32>
    %27 = vector.shape_cast %24 : vector<64x128xf32> to vector<1x64x128xf32>
    tpu.vector_store %arg4[%c0_14, %c0_15, %c0_16], %27 {strides = array<i32>} : memref<1x64x128xf32, #tpu.memory_space<vmem>>, vector<1x64x128xf32>,
    return
  }
  func.func @transform_0(%arg0: i32) -> (i32, i32, i32) {
    %c0_i32 = arith.constant 0 : i32
    %c0_i32_0 = arith.constant 0 : i32
    %c0_i32_1 = arith.constant 0 : i32
    return %arg0, %c0_i32, %c0_i32_0 : i32, i32, i32
  }
  func.func @transform_1(%arg0: i32) -> (i32, i32) {
    %c0_i32 = arith.constant 0 : i32
    %c0_i32_0 = arith.constant 0 : i32
    %c0_i32_1 = arith.constant 0 : i32
    return %c0_i32, %c0_i32_0 : i32, i32
  }
  func.func @transform_2(%arg0: i32) -> (i32, i32) {
    %c0_i32 = arith.constant 0 : i32
    %c0_i32_0 = arith.constant 0 : i32
    %c0_i32_1 = arith.constant 0 : i32
    return %c0_i32, %c0_i32_0 : i32, i32
  }
  func.func @transform_3(%arg0: i32) -> (i32, i32, i32) {
    %c0_i32 = arith.constant 0 : i32
    %c0_i32_0 = arith.constant 0 : i32
    %c0_i32_1 = arith.constant 0 : i32
    return %arg0, %c0_i32, %c0_i32_0 : i32, i32, i32
  }
}

</mosaic_0001>

<bundles_post_ra>
// kernel: tpu_custom_call.1
= control target key start
LH: loop header
LB: loop body
LE: loop exit
PB: predicated region body
PF: predicated region fallthrough
CT: control target
= control target key end

     0   :  { %8 = vsyncpa [#allocation3], 0  ;;  %s1155_s0 = inlined_call_operand.hbm [shape: f32[2,64,128], index: 0, kind: input, shape index: {}]   ;;  %s1156_s1 = inlined_call_operand.vmem [shape: f32[4,64], index: 1, kind: input, shape index: {}]   ;;  %s1157_s2 = inlined_call_operand.vmem [shape: f32[64,4], index: 2, kind: input, shape index: {}]   ;;  %s1158_s3 = inlined_call_operand.hbm [shape: f32[2,64,128], index: 3, kind: output, shape index: {}]  }
   0x1   :  { %10 = vsyncpa [#allocation3 + $0x1], 0 }
   0x2   :  { %11 = vsyncpa [#allocation4], 0 }
   0x3   :  { %13 = vsyncpa [#allocation4 + $0x1], 0  ;;  %s893_s12 = smov 0   ;;  %s895_s13 = smov 0  }
   0x4   :  { %s897_s14 = smov 0   ;;  %s899_s15 = smov 0  }
   0x5 LB: > { %s914_s16 = sadd.s32 4294967295, %s866_s15   ;;  %s643_s17 = sadd.s32 4294967294, %s866_s15   ;;  %s866_s15 = sphi %s899_s15, %s1170_s15   ;;  %s862_s14 = sphi %s897_s14, %s1169_s14   ;;  %s858_s13 = sphi %s895_s13, %s1168_s13   ;;  %s854_s12 = sphi %s893_s12, %s1167_s12  }
   0x6   : > { %s918_s18 = sadd.s32 1, %s866_s15   ;;  %s26_s19 = sadd.s32 1, %s862_s14 }
   0x7   : > { %s23_s20 = ssub.s32 %s866_s15, %s918_s18  ;;  %p33_p0 = scmp.ne.s32.totalorder %s862_s14, %s858_s13 }
   0x8   : > { %p24_p1 = scmp.eq.s32.totalorder %s23_s20, 0  ;;  %p34_p2 = scmp.eq.s32.totalorder %s866_s15, 0 }
   0x9   : > { %p39_p3 = scmp.ne.s32.totalorder %s858_s13, %s854_s12  ;;  %p40_p4 = scmp.eq.s32.totalorder %s914_s16, 0 }
   0xa   : > { %s930_s21 = scalar_select %p24_p1, %s862_s14, %s26_s19  }
   0xb   : > { %p932_p5 = por %p34_p2, %p33_p0  ;;  %p936_p6 = por %p40_p4, %p39_p3 }
   0xc   : > { %p105_p7 = scmp.eq.s32.totalorder %s914_s16, 1  ;;  %p111_p8 = scmp.eq.s32.totalorder %s643_s17, 1 }
   0xd   : > { %p692_p10 = scmp.lt.s32.totalorder %s866_s15, 2  ;;  %s137_s26 = sand.u32 1, %s862_s14  }
   0xe   : > { %p943_p11 = por %p105_p7, %p33_p0  ;;  %p947_p12 = por %p111_p8, %p39_p3 }
   0xf   : > { %s676_s27 = sshll.u32 %s866_s15, 6  ;;  %s646_s28 = sshll.u32 %s137_s26, 6 }
  0x10   : > { %s146_s4 = scalar_lea.hbm %s1155_s0, %s676_s27  ;;  %s141_s6 = scalar_lea.vmem [#allocation2], %s646_s28 }
  0x11   : > { %s147_s5 = sshll.u32 %s146_s4, 4  ;;  %s149_s7 = sshll.u32 %s141_s6, 4  ;;  %s148_s5 = int_to_ptr.hbm [resolvable:$true] %s147_s5  ;;  %s150_s7 = int_to_ptr.vmem [resolvable:$true] %s149_s7 }
  0x12   : > { %p958_p13 = pnand %p692_p10, %p932_p5  ;;  %p649_p0 = scmp.ge.s32.totalorder %s866_s15, 1 }
  0x13   : > { %p157_p1 = scmp.lt.s32.totalorder %s866_s15, 3  ;;  %s138_s9 = scalar_lea.sflag [#allocation3], %s137_s26 }
  0x14   : > { %s770_s10 = sshra.s32 %s148_s5, 4  ;;  %p774_p3 = pneg %p958_p13  ;;  %s771_s10 = int_to_ptr.hbm [resolvable:$true] %s770_s10 }
  0x15   : > { %s772_s11 = scalar_lea.hbm %s771_s10, 64  ;;  %s777_s20 = scalar_lea.hbm %s1155_s0, 128 }
  0x16   : > { %p773_p2 = scmp.ne.s32.totalorder %s771_s10, %s772_s11  ;;  %p778_p5 = scmp.lt.s32.totalorder %s771_s10, %s1155_s0 }
  0x17   : > { %p779_p8 = scmp.lt.s32.totalorder %s777_s20, %s772_s11 }
  0x18   : > { %p775_p4 = pnand %p774_p3, %p773_p2 }
  0x19   : > { %p780_p10 = por %p779_p8, %p778_p5 }
  0x1a   : > { %p776_p7 = pneg %p775_p4 }
  0x1c   : > { %p781_p9 = pnand %p780_p10, %p776_p7 }
  0x1e   : > { %784 = shalt.err (!%p781_p9)
}
  0x1f   : > { %s868_s26 = smov 128   ;;  %s869_s28 = smov 8  }
  0x20   : > { %687 = dma.hbm_to_vmem [thread:$0]  (!%p958_p13), %s148_s5, 1024, %s150_s7, %s138_s9, %s868_s26, %s868_s26, %s869_s28  }
  0x21   : > { %p158_p2 = pnand %p649_p0, %p157_p1 }
  0x22   : > { %s979_s29 = sand.u32 (!%p158_p2), 1, %s858_s13  }
  0x23   : > { %161 = sbr.rel (%p158_p2) target bundleno = 647 (0x287), region = 32  ;;  %s650_s30 = sshll.u32 (!%p158_p2), %s979_s29, 6 }
  0x24   : > { %s164_s4 = scalar_lea.sflag (!%p158_p2), [#allocation3], %s979_s29  ;;  %s167_s6 = scalar_lea.vmem (!%p158_p2), [#allocation2], %s650_s30 }
  0x28   : > { %845 = dma.done.wait (%p936_p6), %s164_s4, 1024  }
  0x29   : > { %847 = vsyncadd (%p936_p6), %s164_s4, 4294966272  ;;  %v989_v0 = vld [vmem:[%s167_s6 + $0x38] sm:$0xff]  ;;  %v991_v1 = vld [vmem:[%s167_s6 + $0x28] sm:$0xff]  ;;  %vm224_vm0 = vcmask 523264   ;;  %vm301_vm5 = vcmask 1043456   ;;  %vm276_vm6 = vcmask 31744  }
  0x2a   : > { %213 = vadd.xlane.f32.xlu0 %v989_v0  ;;  %209 = vadd.xlane.f32.xlu1 %v991_v1  ;;  %v995_v2 = vld [vmem:[%s167_s6 + $0x18] sm:$0xff]  ;;  %v998_v3 = vld [vmem:[%s167_s6 + $0x30] sm:$0xff]  ;;  %v1000_v4 = vld [vmem:[%s167_s6 + $0x20] sm:$0xff]  ;;  %v870_v48 = vmov 0   ;;  %s190_s7 = scalar_lea.vmem [#allocation5], %s650_s30  ;;  %s677_s30 = sshll.u32 %s914_s16, 6 }
  0x2b   : > { %205 = vadd.xlane.f32.xlu2 %v995_v2  ;;  %v1002_v5 = vld [vmem:[%s167_s6 + $0x10] sm:$0xff]  ;;  %v1007_v6 = vld [vmem:[%s167_s6 + $0x8] sm:$0xff]  ;;  %v1009_v7 = vld [vmem:[%s167_s6] sm:$0xff]  ;;  %732 = vset.pattern.permute.xlu0 %v870_v48  ;;  %s566_s10 = scalar_lea.hbm %s1158_s3, %s677_s30  ;;  %s567_s11 = sshll.u32 %s190_s7, 4  ;;  %s568_s11 = int_to_ptr.vmem [resolvable:$true] %s567_s11 }
  0x2c   : > { %v223_v24 = vld [vmem:[%s1156_s1] sm:$0xf]  ;;  %v271_v41 = vld [vmem:[%s1157_s2 + $0x18] sm:$0xff]  ;;  %v274_v42 = vld [vmem:[%s1157_s2 + $0x30] sm:$0xff]  ;;  %731 = vset.pattern.permute.xlu2 %v870_v48  ;;  %733 = vset.pattern.permute.xlu1 %v870_v48  ;;  %s569_s17 = sshll.u32 %s566_s10, 4  ;;  %s555_s19 = scalar_lea.sflag [#allocation4], %s979_s29  ;;  %s570_s17 = int_to_ptr.hbm [resolvable:$true] %s569_s17 }
  0x2d   : > { %v268_v40 = vld [vmem:[%s1157_s2] sm:$0xff]  ;;  %v269_v43 = vld [vmem:[%s1157_s2 + $0x8] sm:$0xff]  ;;  %v275_v45 = vld [vmem:[%s1157_s2 + $0x38] sm:$0xff]  ;;  %s814_s20 = sshra.s32 %s570_s17, 4  ;;  %s820_s26 = scalar_lea.hbm %s1158_s3, 128  ;;  %s815_s20 = int_to_ptr.hbm [resolvable:$true] %s814_s20 }
  0x2e   : > { %v272_v44 = vld [vmem:[%s1157_s2 + $0x20] sm:$0xff]  ;;  %v270_v46 = vld [vmem:[%s1157_s2 + $0x10] sm:$0xff]  ;;  %v273_v47 = vld [vmem:[%s1157_s2 + $0x28] sm:$0xff]  ;;  %s816_s16 = scalar_lea.hbm %s815_s20, 64  ;;  %p821_p0 = scmp.lt.s32.totalorder %s815_s20, %s1158_s3 }
  0x2f   : > { %p817_p6 = scmp.ne.s32.totalorder %s815_s20, %s816_s16  ;;  %p822_p1 = scmp.lt.s32.totalorder %s820_s26, %s816_s16 }
  0x31   : > { %p818_p9 = pnand %p817_p6, %p943_p11  ;;  %p823_p3 = por %p822_p1, %p821_p0 }
  0x32   : > { %211 = vadd.xlane.f32.xlu0 %v998_v3  ;;  %207 = vadd.xlane.f32.xlu1 %v1000_v4 }
  0x33   : > { %203 = vadd.xlane.f32.xlu2 %v1002_v5  ;;  %p819_p13 = pneg %p818_p9 }
  0x35   : > { %p824_p4 = pnand %p823_p3, %p819_p13 }
  0x3a   : > { %201 = vadd.xlane.f32.xlu0 %v1007_v6  ;;  %199 = vadd.xlane.f32.xlu1 %v1009_v7 }
  0x9d   : > { %v214_v8 = vpop.xlane.xlu0 %213  ;;  %v210_v9 = vpop.xlane.xlu1 %209 }
  0x9e   : > { %v222_v10 = vmul.f32 0.0078125, %v214_v8  ;;  %v206_v11 = vpop.xlane.xlu2 %205  ;;  %v220_v15 = vmul.f32 0.0078125, %v210_v9 }
  0x9f   : > { %v218_v18 = vmul.f32 0.0078125, %v206_v11 }
  0xa0   : > { %236 = vmatpush.msra.mxu0 %v222_v10 }
  0xa5   : > { %v212_v12 = vpop.xlane.xlu0 %211  ;;  %v208_v13 = vpop.xlane.xlu1 %207 }
  0xa6   : > { %v221_v14 = vmul.f32 0.0078125, %v212_v12  ;;  %v219_v16 = vmul.f32 0.0078125, %v208_v13  ;;  %v204_v17 = vpop.xlane.xlu2 %203 }
  0xa7   : > { %v217_v19 = vmul.f32 0.0078125, %v204_v17 }
  0xa8   : > { %237 = vmatpush.msra.mxu0 %v221_v14 }
  0xaa   : > { %238 = vmatpush.msra.mxu0 %v220_v15 }
  0xac   : > { %239 = vmatpush.msra.mxu0 %v219_v16 }
  0xad   : > { %v202_v20 = vpop.xlane.xlu0 %201  ;;  %v200_v21 = vpop.xlane.xlu1 %199 }
  0xae   : > { %240 = vmatpush.msra.mxu0 %v218_v18  ;;  %v216_v22 = vmul.f32 0.0078125, %v202_v20  ;;  %v215_v23 = vmul.f32 0.0078125, %v200_v21 }
  0xb0   : > { %241 = vmatpush.msra.mxu0 %v217_v19 }
  0xb2   : > { %242 = vmatpush.msra.mxu0 %v216_v22 }
  0xb4   : > { %243 = vmatpush.msra.mxu0 %v215_v23 }
  0xb5   : > { %652 = vmatmul.msk.f32.vlgmr.msra.gmra.mxu0 %vm224_vm0, %v223_v24 }
 0x132   : > { %v245_v25 = vpop.f32.mrf.mxu0 }
 0x133   : > { %v653_v26 = vmul.f32 -1.442695, %v245_v25 }
 0x135   : > { %734 = vpow2.f32 %v653_v26 }
 0x13b   : > { %v735_v27 = vpop.eup %734 }
 0x13c   : > { %v251_v28 = vadd.f32 1.0, %v735_v27 }
 0x13e   : > { %736 = vrcp.f32 %v251_v28  ;;  %v263_v32 = vand.u32 2147483648, %v251_v28  ;;  %v261_v34 = vand.u32 2147483647, %v251_v28  ;;  %vm257_vm2 = vweird.f32 %v251_v28 }
 0x140   : > { %v264_v36 = vor.u32 1.1754944e-38, %v263_v32  ;;  %vm262_vm4 = vcmp.eq.f32.partialorder %v261_v34, 8.507059e+37 }
 0x144   : > { %v737_v29 = vpop.eup %736 }
 0x145   : > { %v253_v30 = vmul.f32 %v737_v29, %v251_v28  ;;  %vm258_vm1 = vweird.f32 %v737_v29 }
 0x146   : > { %vm259_vm3 = vmor %vm257_vm2, %vm258_vm1 }
 0x147   : > { %v254_v31 = vsub.f32 1.0, %v253_v30 }
 0x149   : > { %v255_v33 = vmul.f32 %v737_v29, %v254_v31 }
 0x14b   : > { %v256_v35 = vadd.f32 %v737_v29, %v255_v33 }
 0x14d   : > { %v260_v37 = vsel %vm259_vm3, %v737_v29, %v256_v35 }
 0x14e   : > { %v265_v38 = vsel %vm262_vm4, %v264_v36, %v260_v37 }
 0x14f   : > { %v267_v39 = vmul.f32 %v265_v38, %v245_v25 }
 0x151   : > { %654 = vmatpush.msk.msra.mxu1 %vm301_vm5, %v267_v39  ;;  %678 = vmatpush.msk.msra.mxu2 %vm301_vm5, %v267_v39 }
 0x152   : > { %679 = vmatpush.msk.msra.mxu3 %vm301_vm5, %v267_v39  ;;  %655 = vmatmul.msk.f32.vlgmr.msra.gmra.mxu1 %vm276_vm6, %v268_v40 }
 0x153   : > { %658 = vmatmul.msk.f32.vlgmr.msra.gmra.mxu2 %vm276_vm6, %v271_v41  ;;  %661 = vmatmul.msk.f32.vlgmr.msra.gmra.mxu3 %vm276_vm6, %v274_v42 }
 0x15a   : > { %656 = vmatmul.msk.f32.gmra.mxu1 %vm276_vm6, %v269_v43 }
 0x15b   : > { %659 = vmatmul.msk.f32.gmra.mxu2 %vm276_vm6, %v272_v44  ;;  %662 = vmatmul.msk.f32.gmra.mxu3 %vm276_vm6, %v275_v45 }
 0x162   : > { %657 = vmatmul.msk.f32.gmra.mxu1 %vm276_vm6, %v270_v46 }
 0x163   : > { %660 = vmatmul.msk.f32.gmra.mxu2 %vm276_vm6, %v273_v47 }
 0x1cf   : > { %v322_v49 = vpop.f32.mrf.mxu1 }
 0x1d0   : > { %v663_v50 = vmul.f32 -1.442695, %v322_v49 }
 0x1d2   : > { %738 = vpow2.f32 %v663_v50 }
 0x1d6   : > { %v331_v51 = vpop.f32.mrf.mxu2  ;;  %v340_v52 = vpop.f32.mrf.mxu3 }
 0x1d7   : > { %v666_v53 = vmul.f32 -1.442695, %v331_v51  ;;  %v325_v54 = vpop.f32.mrf.mxu1  ;;  %v669_v57 = vmul.f32 -1.442695, %v340_v52 }
 0x1d8   : > { %v739_v55 = vpop.eup %738  ;;  %v664_v56 = vmul.f32 -1.442695, %v325_v54 }
 0x1d9   : > { %v370_v58 = vadd.f32 1.0, %v739_v55  ;;  %740 = vpow2.f32 %v666_v53 }
 0x1da   : > { %742 = vpow2.f32 %v664_v56 }
 0x1db   : > { %744 = vrcp.f32 %v370_v58  ;;  %v389_v18 = vand.u32 2147483648, %v370_v58  ;;  %v387_v21 = vand.u32 2147483647, %v370_v58  ;;  %vm383_vm8 = vweird.f32 %v370_v58 }
 0x1dc   : > { %746 = vpow2.f32 %v669_v57 }
 0x1dd   : > { %v390_v28 = vor.u32 1.1754944e-38, %v389_v18  ;;  %vm388_vm10 = vcmp.eq.f32.partialorder %v387_v21, 8.507059e+37 }
 0x1de   : > { %v334_v59 = vpop.f32.mrf.mxu2  ;;  %v343_v63 = vpop.f32.mrf.mxu3 }
 0x1df   : > { %v741_v60 = vpop.eup %740  ;;  %v667_v61 = vmul.f32 -1.442695, %v334_v59  ;;  %v328_v62 = vpop.f32.mrf.mxu1  ;;  %v670_v14 = vmul.f32 -1.442695, %v343_v63 }
 0x1e0   : > { %v743_v8 = vpop.eup %742  ;;  %v1048_v9 = vadd.f32 1.0, %v741_v60  ;;  %v665_v10 = vmul.f32 -1.442695, %v328_v62 }
 0x1e1   : > { %v745_v11 = vpop.eup %744  ;;  %v1050_v12 = vadd.f32 1.0, %v743_v8  ;;  %748 = vpow2.f32 %v667_v61 }
 0x1e2   : > { %v747_v13 = vpop.eup %746  ;;  %750 = vrcp.f32 %v1048_v9  ;;  %v379_v15 = vmul.f32 %v745_v11, %v370_v58  ;;  %vm384_vm7 = vweird.f32 %v745_v11  ;;  %v434_v37 = vand.u32 2147483648, %v1048_v9 }
 0x1e3   : > { %752 = vrcp.f32 %v1050_v12  ;;  %v1054_v16 = vadd.f32 1.0, %v747_v13  ;;  %vm385_vm9 = vmor %vm383_vm8, %vm384_vm7  ;;  %v404_v39 = vand.u32 2147483648, %v1050_v12  ;;  %v432_v43 = vand.u32 2147483647, %v1048_v9 }
 0x1e4   : > { %754 = vpow2.f32 %v665_v10  ;;  %v380_v17 = vsub.f32 1.0, %v379_v15  ;;  %v402_v45 = vand.u32 2147483647, %v1050_v12  ;;  %vm428_vm13 = vweird.f32 %v1048_v9 }
 0x1e5   : > { %756 = vpow2.f32 %v670_v14  ;;  %vm398_vm14 = vweird.f32 %v1050_v12  ;;  %v435_v50 = vor.u32 1.1754944e-38, %v434_v37  ;;  %v405_v54 = vor.u32 1.1754944e-38, %v404_v39 }
 0x1e6   : > { %v337_v19 = vpop.f32.mrf.mxu2  ;;  %v381_v20 = vmul.f32 %v745_v11, %v380_v17  ;;  %758 = vrcp.f32 %v1054_v16  ;;  %vm433_vm1 = vcmp.eq.f32.partialorder %v432_v43, 8.507059e+37  ;;  %vm403_vm2 = vcmp.eq.f32.partialorder %v402_v45, 8.507059e+37 }
 0x1e7   : > { %v749_v22 = vpop.eup %748  ;;  %v668_v23 = vmul.f32 -1.442695, %v337_v19  ;;  %vm473_vm5 = vweird.f32 %v1054_v16 }
 0x1e8   : > { %v751_v24 = vpop.eup %750  ;;  %v1057_v25 = vadd.f32 1.0, %v749_v22  ;;  %v382_v26 = vadd.f32 %v745_v11, %v381_v20 }
 0x1e9   : > { %v753_v27 = vpop.eup %752  ;;  %760 = vpow2.f32 %v668_v23  ;;  %v424_v29 = vmul.f32 %v751_v24, %v1048_v9  ;;  %vm429_vm11 = vweird.f32 %v751_v24 }
 0x1ea   : > { %v755_v30 = vpop.eup %754  ;;  %762 = vrcp.f32 %v1057_v25  ;;  %v386_v31 = vsel %vm385_vm9, %v745_v11, %v382_v26  ;;  %v394_v32 = vmul.f32 %v753_v27, %v1050_v12  ;;  %vm399_vm12 = vweird.f32 %v753_v27  ;;  %vm430_vm15 = vmor %vm428_vm13, %vm429_vm11 }
 0x1eb   : > { %v1062_v33 = vadd.f32 1.0, %v755_v30  ;;  %v391_v34 = vsel %vm388_vm10, %v390_v28, %v386_v31  ;;  %v425_v35 = vsub.f32 1.0, %v424_v29  ;;  %v757_v36 = vpop.eup %756  ;;  %vm400_vm0 = vmor %vm398_vm14, %vm399_vm12  ;;  %v449_v8 = vand.u32 2147483648, %v1057_v25 }
 0x1ec   : > { %500 = vperm.xlu2 %731, %v391_v34   ;;  %v395_v38 = vsub.f32 1.0, %v394_v32  ;;  %v1066_v40 = vpop.eup %758  ;;  %v1069_v41 = vadd.f32 1.0, %v757_v36  ;;  %v447_v9 = vand.u32 2147483647, %v1057_v25  ;;  %vm443_vm4 = vweird.f32 %v1057_v25 }
 0x1ed   : > { %764 = vrcp.f32 %v1062_v33  ;;  %v426_v42 = vmul.f32 %v751_v24, %v425_v35  ;;  %v469_v52 = vmul.f32 %v1066_v40, %v1054_v16  ;;  %v419_v13 = vand.u32 2147483648, %v1062_v33 }
 0x1ee   : > { %v396_v44 = vmul.f32 %v753_v27, %v395_v38  ;;  %766 = vrcp.f32 %v1069_v41  ;;  %v417_v17 = vand.u32 2147483647, %v1062_v33  ;;  %v450_v20 = vor.u32 1.1754944e-38, %v449_v8 }
 0x1ef   : > { %v761_v46 = vpop.eup %760  ;;  %v427_v47 = vadd.f32 %v751_v24, %v426_v42  ;;  %v470_v62 = vsub.f32 1.0, %v469_v52  ;;  %vm413_vm8 = vweird.f32 %v1062_v33  ;;  %vm448_vm9 = vcmp.eq.f32.partialorder %v447_v9, 8.507059e+37 }
 0x1f0   : > { %v763_v48 = vpop.eup %762  ;;  %v1075_v49 = vadd.f32 1.0, %v761_v46  ;;  %v397_v51 = vadd.f32 %v753_v27, %v396_v44  ;;  %vm474_vm10 = vweird.f32 %v1066_v40  ;;  %v479_v26 = vand.u32 2147483648, %v1054_v16 }
 0x1f1   : > { %v431_v53 = vsel %vm430_vm15, %v751_v24, %v427_v47  ;;  %v439_v55 = vmul.f32 %v763_v48, %v1057_v25  ;;  %vm444_vm3 = vweird.f32 %v763_v48  ;;  %v471_v18 = vmul.f32 %v1066_v40, %v470_v62  ;;  %vm1099_vm13 = vmor %vm473_vm5, %vm474_vm10 }
 0x1f2   : > { %768 = vrcp.f32 %v1075_v49  ;;  %v401_v56 = vsel %vm400_vm0, %v753_v27, %v397_v51  ;;  %v436_v58 = vsel %vm433_vm1, %v435_v50, %v431_v53  ;;  %vm445_vm6 = vmor %vm443_vm4, %vm444_vm3  ;;  %v420_v25 = vor.u32 1.1754944e-38, %v419_v13 }
 0x1f3   : > { %v765_v57 = vpop.eup %764  ;;  %v406_v59 = vsel %vm403_vm2, %v405_v54, %v401_v56  ;;  %v440_v60 = vsub.f32 1.0, %v439_v55  ;;  %vm418_vm12 = vcmp.eq.f32.partialorder %v417_v17, 8.507059e+37  ;;  %v472_v29 = vadd.f32 %v1066_v40, %v471_v18 }
 0x1f4   : > { %515 = vperm.xlu2 %731, %v436_v58   ;;  %505 = vperm.xlu0 %732, %v406_v59   ;;  %v409_v61 = vmul.f32 %v765_v57, %v1062_v33  ;;  %v767_v11 = vpop.eup %766  ;;  %vm414_vm7 = vweird.f32 %v765_v57  ;;  %v477_v30 = vand.u32 2147483647, %v1054_v16  ;;  %v480_v35 = vor.u32 1.1754944e-38, %v479_v26 }
 0x1f5   : > { %v441_v63 = vmul.f32 %v763_v48, %v440_v60  ;;  %v484_v23 = vmul.f32 %v767_v11, %v1069_v41  ;;  %vm415_vm11 = vmor %vm413_vm8, %vm414_vm7  ;;  %v464_v37 = vand.u32 2147483648, %v1075_v49  ;;  %v476_v38 = vsel %vm1099_vm13, %v1066_v40, %v472_v29 }
 0x1f6   : > { %v410_v10 = vsub.f32 1.0, %v409_v61  ;;  %vm478_vm15 = vcmp.eq.f32.partialorder %v477_v30, 8.507059e+37  ;;  %vm458_vm0 = vweird.f32 %v1075_v49  ;;  %v462_v16 = vand.u32 2147483647, %v1075_v49 }
 0x1f7   : > { %v442_v12 = vadd.f32 %v763_v48, %v441_v63  ;;  %v485_v34 = vsub.f32 1.0, %v484_v23  ;;  %v481_v43 = vsel %vm478_vm15, %v480_v35, %v476_v38  ;;  %v465_v44 = vor.u32 1.1754944e-38, %v464_v37 }
 0x1f8   : > { %v769_v14 = vpop.eup %768  ;;  %v411_v15 = vmul.f32 %v765_v57, %v410_v10  ;;  %vm463_vm2 = vcmp.eq.f32.partialorder %v462_v16, 8.507059e+37  ;;  %vm488_vm3 = vweird.f32 %v1069_v41  ;;  %vm489_vm4 = vweird.f32 %v767_v11 }
 0x1f9   : > { %v446_v19 = vsel %vm445_vm6, %v763_v48, %v442_v12  ;;  %v454_v21 = vmul.f32 %v769_v14, %v1075_v49  ;;  %vm459_vm14 = vweird.f32 %v769_v14  ;;  %v486_v42 = vmul.f32 %v767_v11, %v485_v34  ;;  %vm490_vm5 = vmor %vm488_vm3, %vm489_vm4 }
 0x1fa   : > { %v412_v22 = vadd.f32 %v765_v57, %v411_v15  ;;  %v451_v24 = vsel %vm448_vm9, %v450_v20, %v446_v19  ;;  %vm460_vm1 = vmor %vm458_vm0, %vm459_vm14  ;;  %v494_v46 = vand.u32 2147483648, %v1069_v41  ;;  %v492_v47 = vand.u32 2147483647, %v1069_v41 }
 0x1fb   : > { %v455_v27 = vsub.f32 1.0, %v454_v21  ;;  %v487_v40 = vadd.f32 %v767_v11, %v486_v42 }
 0x1fc   : > { %520 = vperm.xlu2 %731, %v451_v24   ;;  %v416_v28 = vsel %vm415_vm11, %v765_v57, %v412_v22  ;;  %v495_v48 = vor.u32 1.1754944e-38, %v494_v46  ;;  %vm493_vm6 = vcmp.eq.f32.partialorder %v492_v47, 8.507059e+37 }
 0x1fd   : > { %v421_v31 = vsel %vm418_vm12, %v420_v25, %v416_v28  ;;  %v456_v33 = vmul.f32 %v769_v14, %v455_v27  ;;  %v491_v49 = vsel %vm490_vm5, %v767_v11, %v487_v40 }
 0x1fe   : > { %510 = vperm.xlu1 %733, %v421_v31   ;;  %v496_v50 = vsel %vm493_vm6, %v495_v48, %v491_v49 }
 0x1ff   : > { %v457_v36 = vadd.f32 %v769_v14, %v456_v33 }
 0x201   : > { %v461_v39 = vsel %vm460_vm1, %v769_v14, %v457_v36 }
 0x202   : > { %v466_v45 = vsel %vm463_vm2, %v465_v44, %v461_v39 }
 0x204   : > { %530 = vperm.xlu2 %731, %v481_v43  }
 0x206   : > { %525 = vperm.xlu1 %733, %v466_v45  }
 0x20e   : > { %535 = vperm.xlu1 %733, %v496_v50  }
 0x246   : > { %v501_v51 = vpop.permute.xlu2 %500 }
 0x247   : > { %v538_v52 = vmul.f32 %v501_v51, %v1009_v7 }
 0x249   : > { %546 = vst [vmem:[%s190_s7] sm:$0xff] %v538_v52 }
 0x24e   : > { %v516_v53 = vpop.permute.xlu2 %515 }
 0x24f   : > { %v541_v54 = vmul.f32 %v516_v53, %v995_v2 }
 0x251   : > { %549 = vst [vmem:[%s190_s7 + $0x18] sm:$0xff] %v541_v54 }
 0x256   : > { %v521_v55 = vpop.permute.xlu2 %520 }
 0x257   : > { %v542_v41 = vmul.f32 %v521_v55, %v1000_v4 }
 0x259   : > { %550 = vst [vmem:[%s190_s7 + $0x20] sm:$0xff] %v542_v41 }
 0x25e   : > { %v531_v56 = vpop.permute.xlu2 %530 }
 0x25f   : > { %v544_v57 = vmul.f32 %v531_v56, %v998_v3 }
 0x261   : > { %552 = vst [vmem:[%s190_s7 + $0x30] sm:$0xff] %v544_v57 }
 0x266   : > { %v506_v58 = vpop.permute.xlu0 %505 }
 0x267   : > { %v539_v59 = vmul.f32 %v506_v58, %v1007_v6 }
 0x269   : > { %547 = vst [vmem:[%s190_s7 + $0x8] sm:$0xff] %v539_v59 }
 0x270   : > { %v511_v7 = vpop.permute.xlu1 %510 }
 0x271   : > { %v540_v60 = vmul.f32 %v511_v7, %v1002_v5 }
 0x273   : > { %548 = vst [vmem:[%s190_s7 + $0x10] sm:$0xff] %v540_v60 }
 0x278   : > { %v526_v61 = vpop.permute.xlu1 %525 }
 0x279   : > { %v543_v2 = vmul.f32 %v526_v61, %v991_v1 }
 0x27b   : > { %551 = vst [vmem:[%s190_s7 + $0x28] sm:$0xff] %v543_v2 }
 0x280   : > { %v536_v3 = vpop.permute.xlu1 %535 }
 0x281   : > { %v545_v4 = vmul.f32 %v536_v3, %v989_v0 }
 0x283   : > { %553 = vst [vmem:[%s190_s7 + $0x38] sm:$0xff] %v545_v4 }
 0x284   : > { %827 = shalt.err (!%p824_p4)
}
 0x285   : > { %s871_s29 = smov 128   ;;  %s872_s6 = smov 8  }
 0x286   : > { %682 = dma.vmem_to_hbm [thread:$0]  (%p943_p11), %s568_s11, 1024, %s570_s17, %s555_s19, %s871_s29, %s871_s29, %s872_s6  }
 0x287 PF: > { %s584_s23 = sand.u32 1, %s854_s12   ;;  %p1166_p7 = scmp.ge.s32.totalorder %s866_s15, 2 }
 0x288   : > { %s585_s5 = scalar_lea.sflag [#allocation4], %s584_s23 }
 0x289   : > { %p689_p5 = pnand %p1166_p7, %p947_p12 }
 0x28b   : > { %p690_p8 = pneg %p689_p5 }
 0x28d   : > { %849 = dma.done.wait (%p690_p8), %s585_s5, 1024  }
 0x28e   : > { %851 = vsyncadd (%p690_p8), %s585_s5, 4294966272  ;;  %p16_p10 = scmp.ge.s32.totalorder %s918_s18, 4   ;;  %s1167_s12 = smov %s858_s13 }
 0x28f   : > { %s1168_s13 = smov %s862_s14  ;;  %s1169_s14 = smov %s930_s21 }
 0x290   : > { %s1170_s15 = smov %s918_s18  ;;  %18 = sbr.rel (!%p16_p10) target bundleno = 5 (0x5), region = 77 }
 0x295   :  { %591 = vsyncpa [#allocation3], 1 }
 0x296   :  { %593 = vsyncpa [#allocation3 + $0x1], 1 }
 0x297   :  { %594 = vsyncpa [#allocation4], 1 }
 0x298   :  { %596 = vsyncpa [#allocation4 + $0x1], 1 }

</bundles_post_ra>
